<compile_context>
chip_gen: v5e
topology: v5e:2x2
jax: 0.10.0
libtpu: 0.0.40
codegen_flags: <defaults>
</compile_context>

<pallas_src>
import functools

import jax
import jax.numpy as jnp
from jax.experimental import pallas as pl
from jax.experimental.pallas import tpu as pltpu


# ----------------------------------------------------------------------------
# Pallas kernel: fused log-sum-exp + label-smoothing loss + batch-mean reduction
# ----------------------------------------------------------------------------
def _label_smoothing_loss_kernel(target_ref, pred_ref, out_ref, col_ref, acc_ref, *,
                                 off, coef, inv_n, n_rows, tm, tiles_per_split):
    s = pl.program_id(0)          # megacore split ("parallel")
    i = pl.program_id(1)          # row-tile within split ("arbitrary" reduction)

    # Per-split init: zero the resident scalar accumulator and fill the
    # loop-invariant class-index pattern once (broadcasts are not CSE'd).
    @pl.when(i == 0)
    def _():
        acc_ref[...] = jnp.zeros_like(acc_ref)
        col_ref[...] = jax.lax.broadcasted_iota(jnp.int32, col_ref.shape, 1)

    p = pred_ref[...].astype(jnp.float32)                       # (tm, C), upcast on load

    # Logical rows covered by this tile -> validity mask for ragged / empty tiles.
    tile_idx = s * tiles_per_split + i
    rows = tile_idx * tm + jax.lax.broadcasted_iota(jnp.int32, (tm, 1), 0)
    valid = rows < n_rows                                        # (tm, 1) bool
    p = jnp.where(valid, p, 0.0)                                 # neutralize padding rows

    # Fused algebraic per-row loss:
    #   loss_r = lse(p_r) - off * sum(p_r) - (confidence - off) * p_r[target_r]
    m = jnp.max(p, axis=-1, keepdims=True)
    lse = m + jnp.log(jnp.sum(jnp.exp(p - m), axis=-1, keepdims=True))   # (tm, 1)
    sump = jnp.sum(p, axis=-1, keepdims=True)                            # (tm, 1)
    tgt = target_ref[...]                                                # (tm, 1) int32
    p_t = jnp.sum(jnp.where(col_ref[...] == tgt, p, 0.0),
                  axis=-1, keepdims=True)                                # (tm, 1)

    loss_rows = lse - jnp.float32(off) * sump - jnp.float32(coef) * p_t
    loss_rows = jnp.where(valid, loss_rows, 0.0)

    # Pre-scale by 1/N while accumulating (numerically nicer for large N).
    acc_ref[...] += (jnp.sum(loss_rows) * jnp.float32(inv_n)).reshape(1, 1)

    # Write this split's partial exactly once.
    @pl.when(i == tiles_per_split - 1)
    def _():
        out_ref[...] = acc_ref[...]


# ----------------------------------------------------------------------------
# Wrapper
# ----------------------------------------------------------------------------
def label_smoothing_loss(pred, target, classes, smoothing=0.0, *, tile_rows=None):
    """pred: (N, classes) logits (any float dtype), target: (N,) int labels -> scalar."""
    N, C = pred.shape
    assert C == classes, (C, classes)

    # Tile picker: whole batch as one (full-extent) block when small, otherwise
    # fixed 1024-row tiles (multiple of 8) with a masked ragged last tile.
    if tile_rows is None:
        tm = N if N <= 1024 else 1024
    else:
        tm = min(int(tile_rows), N)
        if tm < N:
            tm = max(8, (tm // 8) * 8)    # sublane-aligned when actually tiling

    n_tiles = pl.cdiv(N, tm)
    nsplit = 2 if n_tiles >= 2 else 1     # expose v7x megacore; no-op on v5e/v6e
    tiles_per_split = pl.cdiv(n_tiles, nsplit)
    last_block = n_tiles - 1

    confidence = 1.0 - float(smoothing)
    off = float(smoothing) / (classes - 1) if classes > 1 else 0.0
    coef = confidence - off

    kernel = functools.partial(
        _label_smoothing_loss_kernel,
        off=off, coef=coef, inv_n=1.0 / N, n_rows=N, tm=tm,
        tiles_per_split=tiles_per_split,
    )

    # Clamp the row-block index so even fully-empty trailing tiles map to a valid
    # window; their contribution is zeroed in-kernel via the logical row mask.
    def row_block(s, i):
        return (jnp.minimum(s * tiles_per_split + i, last_block), 0)

    partials = pl.pallas_call(
        kernel,
        out_shape=jax.ShapeDtypeStruct((nsplit, 1), jnp.float32),
        grid_spec=pltpu.PrefetchScalarGridSpec(
            num_scalar_prefetch=0,
            grid=(nsplit, tiles_per_split),
            in_specs=[
                pl.BlockSpec((tm, 1), row_block),   # targets (int32 column)
                pl.BlockSpec((tm, C), row_block),   # logits, native dtype
            ],
            out_specs=pl.BlockSpec((1, 1), lambda s, i: (s, 0)),  # per-split partial
            scratch_shapes=[
                pltpu.VMEM((tm, C), jnp.int32),     # hoisted class-index iota
                pltpu.VMEM((1, 1), jnp.float32),    # resident scalar accumulator
            ],
        ),
        compiler_params=pltpu.CompilerParams(
            dimension_semantics=("parallel", "arbitrary"),
        ),
    )(target.reshape(N, 1).astype(jnp.int32), pred)

    return jnp.sum(partials)


# ----------------------------------------------------------------------------
# Pure-JAX reference for verification
# ----------------------------------------------------------------------------
def reference_loss(pred, target, classes, smoothing):
    lsm = jax.nn.log_softmax(pred.astype(jnp.float32), axis=-1)
    confidence = 1.0 - smoothing
    off = smoothing / (classes - 1) if classes > 1 else 0.0
    n = pred.shape[0]
    true_dist = jnp.full((n, classes), off, jnp.float32)
    true_dist = true_dist.at[jnp.arange(n), target].set(confidence)
    return jnp.mean(jnp.sum(-true_dist * lsm, axis=-1))


# ----------------------------------------------------------------------------
if __name__ == "__main__":
    key = jax.random.PRNGKey(0)
    k1, k2, k3, k4 = jax.random.split(key, 4)

    C = 10
    smoothing = 0.1

    # (1) Small CIFAR-like batch, f32 logits, single full-extent block.
    N1 = 64
    pred1 = jax.random.normal(k1, (N1, C), jnp.float32)
    tgt1 = jax.random.randint(k2, (N1,), 0, C, jnp.int32)
    out1 = jax.block_until_ready(label_smoothing_loss(pred1, tgt1, C, smoothing))
    ref1 = reference_loss(pred1, tgt1, C, smoothing)
    assert jnp.allclose(out1, ref1, atol=1e-5, rtol=1e-5), (float(out1), float(ref1))

    # (2) Ragged batch, bf16 logits, small explicit tile -> exercises the
    #     multi-tile + megacore split + masked partial/empty last-tile path.
    N2 = 100
    pred2 = jax.random.normal(k3, (N2, C), jnp.float32).astype(jnp.bfloat16)
    tgt2 = jax.random.randint(k4, (N2,), 0, C, jnp.int32)
    out2 = jax.block_until_ready(
        label_smoothing_loss(pred2, tgt2, C, smoothing, tile_rows=16))
    ref2 = reference_loss(pred2, tgt2, C, smoothing)
    assert jnp.allclose(out2, ref2, atol=1e-5, rtol=1e-5), (float(out2), float(ref2))

    # (3) smoothing == 0 degenerates to plain one-hot cross-entropy.
    out3 = jax.block_until_ready(label_smoothing_loss(pred1, tgt1, C, 0.0))
    ref3 = reference_loss(pred1, tgt1, C, 0.0)
    assert jnp.allclose(out3, ref3, atol=1e-5, rtol=1e-5), (float(out3), float(ref3))

    print("KERNEL_OK")
</pallas_src>

<mosaic_0001>
module attributes {stable_mosaic.version = 11 : i64} {
  func.func @_label_smoothing_loss_kernel(%arg0: i32, %arg1: i32, %arg2: memref<64x1xi32, #tpu.memory_space<vmem>>, %arg3: memref<64x10xf32, #tpu.memory_space<vmem>>, %arg4: memref<1x1xf32, #tpu.memory_space<vmem>>, %arg5: memref<64x10xi32, #tpu.memory_space<vmem>>, %arg6: memref<1x1xf32, #tpu.memory_space<vmem>>) attributes {dimension_semantics = [#tpu.dimension_semantics<parallel>, #tpu.dimension_semantics<arbitrary>], iteration_bounds = array<i64: 1, 1>, scalar_prefetch = 0 : i64, scratch_operands = 2 : i64, tpu.core_type = #tpu.core_type<tc>, window_params = [{transform_indices = @transform_0, window_bounds = array<i64: 64, 1>}, {transform_indices = @transform_1, window_bounds = array<i64: 64, 10>}, {transform_indices = @transform_2, window_bounds = array<i64: 1, 1>}]} {
    %c0_i32 = arith.constant 0 : i32
    %0 = arith.cmpi eq, %arg1, %c0_i32 : i32
    %1 = arith.extui %0 : i1 to i32
    %c0_i32_0 = arith.constant 0 : i32
    %2 = arith.cmpi ne, %1, %c0_i32_0 : i32
    scf.if %2 {
      %cst_23 = arith.constant 0.000000e+00 : f32
      %55 = vector.broadcast %cst_23 : f32 to vector<1x1xf32>
      %c0_24 = arith.constant 0 : index
      %c0_25 = arith.constant 0 : index
      %56 = vector.load %arg6[%c0_24, %c0_25] : memref<1x1xf32, #tpu.memory_space<vmem>>, vector<1x1xf32>
      tpu.vector_store %arg6[%c0_24, %c0_25], %55 {strides = array<i32>} : memref<1x1xf32, #tpu.memory_space<vmem>>, vector<1x1xf32>,
      %57 = tpu.iota {dimensions = array<i32: 1>} : vector<64x10xi32>
      %c0_26 = arith.constant 0 : index
      %c0_27 = arith.constant 0 : index
      %58 = vector.load %arg5[%c0_26, %c0_27] : memref<64x10xi32, #tpu.memory_space<vmem>>, vector<64x10xi32>
      tpu.vector_store %arg5[%c0_26, %c0_27], %57 {strides = array<i32>} : memref<64x10xi32, #tpu.memory_space<vmem>>, vector<64x10xi32>,
    } else {
    }
    %c0 = arith.constant 0 : index
    %c0_1 = arith.constant 0 : index
    %3 = vector.load %arg3[%c0, %c0_1] : memref<64x10xf32, #tpu.memory_space<vmem>>, vector<64x10xf32>
    %c1_i32 = arith.constant 1 : i32
    %4 = arith.muli %arg0, %c1_i32 : i32
    %5 = arith.addi %4, %arg1 : i32
    %c64_i32 = arith.constant 64 : i32
    %6 = arith.muli %5, %c64_i32 : i32
    %7 = tpu.iota {dimensions = array<i32: 0>} : vector<64x1xi32>
    %8 = vector.broadcast %6 : i32 to vector<64x1xi32>
    %9 = arith.addi %8, %7 : vector<64x1xi32>
    %c64_i32_2 = arith.constant 64 : i32
    %10 = vector.broadcast %c64_i32_2 : i32 to vector<64x1xi32>
    %11 = arith.cmpi slt, %9, %10 : vector<64x1xi32>
    %cst = arith.constant 0.000000e+00 : f32
    %12 = vector.shape_cast %11 : vector<64x1xi1> to vector<64x1xi1>
    %13 = vector.broadcast %12 : vector<64x1xi1> to vector<64x10xi1>
    %14 = vector.broadcast %cst : f32 to vector<64x10xf32>
    %15 = arith.select %13, %3, %14 : vector<64x10xi1>, vector<64x10xf32>
    %cst_3 = arith.constant dense<0xFF800000> : vector<64xf32>
    %16 = vector.multi_reduction <maximumf>, %15, %cst_3 [1] : vector<64x10xf32> to vector<64xf32>
    %17 = vector.shape_cast %16 : vector<64xf32> to vector<64x1xf32>
    %18 = vector.broadcast %17 : vector<64x1xf32> to vector<64x10xf32>
    %19 = arith.subf %15, %18 : vector<64x10xf32>
    %20 = math.exp %19 : vector<64x10xf32>
    %cst_4 = arith.constant dense<0.000000e+00> : vector<64xf32>
    %21 = vector.multi_reduction <add>, %20, %cst_4 [1] : vector<64x10xf32> to vector<64xf32>
    %22 = vector.shape_cast %21 : vector<64xf32> to vector<64x1xf32>
    %23 = math.log %22 : vector<64x1xf32>
    %24 = arith.addf %17, %23 : vector<64x1xf32>
    %cst_5 = arith.constant dense<0.000000e+00> : vector<64xf32>
    %25 = vector.multi_reduction <add>, %15, %cst_5 [1] : vector<64x10xf32> to vector<64xf32>
    %26 = vector.shape_cast %25 : vector<64xf32> to vector<64x1xf32>
    %c0_6 = arith.constant 0 : index
    %c0_7 = arith.constant 0 : index
    %27 = vector.load %arg2[%c0_6, %c0_7] : memref<64x1xi32, #tpu.memory_space<vmem>>, vector<64x1xi32>
    %c0_8 = arith.constant 0 : index
    %c0_9 = arith.constant 0 : index
    %28 = vector.load %arg5[%c0_8, %c0_9] : memref<64x10xi32, #tpu.memory_space<vmem>>, vector<64x10xi32>
    %29 = vector.broadcast %27 : vector<64x1xi32> to vector<64x10xi32>
    %30 = arith.cmpi eq, %28, %29 : vector<64x10xi32>
    %cst_10 = arith.constant 0.000000e+00 : f32
    %31 = vector.broadcast %cst_10 : f32 to vector<64x10xf32>
    %32 = arith.select %30, %15, %31 : vector<64x10xi1>, vector<64x10xf32>
    %cst_11 = arith.constant dense<0.000000e+00> : vector<64xf32>
    %33 = vector.multi_reduction <add>, %32, %cst_11 [1] : vector<64x10xf32> to vector<64xf32>
    %34 = vector.shape_cast %33 : vector<64xf32> to vector<64x1xf32>
    %cst_12 = arith.constant 0.0111111114 : f32
    %35 = vector.broadcast %cst_12 : f32 to vector<64x1xf32>
    %36 = arith.mulf %35, %26 : vector<64x1xf32>
    %37 = arith.subf %24, %36 : vector<64x1xf32>
    %cst_13 = arith.constant 0.888888895 : f32
    %38 = vector.broadcast %cst_13 : f32 to vector<64x1xf32>
    %39 = arith.mulf %38, %34 : vector<64x1xf32>
    %40 = arith.subf %37, %39 : vector<64x1xf32>
    %cst_14 = arith.constant 0.000000e+00 : f32
    %41 = vector.broadcast %cst_14 : f32 to vector<64x1xf32>
    %42 = arith.select %11, %40, %41 : vector<64x1xi1>, vector<64x1xf32>
    %c0_15 = arith.constant 0 : index
    %c0_16 = arith.constant 0 : index
    %43 = vector.load %arg6[%c0_15, %c0_16] : memref<1x1xf32, #tpu.memory_space<vmem>>, vector<1x1xf32>
    %44 = vector.shape_cast %42 : vector<64x1xf32> to vector<1x64x1xf32>
    %cst_17 = arith.constant dense<0.000000e+00> : vector<1xf32>
    %45 = vector.multi_reduction <add>, %44, %cst_17 [1, 2] : vector<1x64x1xf32> to vector<1xf32>
    %46 = vector.shape_cast %45 : vector<1xf32> to vector<1x1x1xf32>
    %47 = vector.extract %46[0, 0, 0] : f32 from vector<1x1x1xf32>
    %cst_18 = arith.constant 1.562500e-02 : f32
    %48 = arith.mulf %47, %cst_18 : f32
    %49 = vector.broadcast %48 : f32 to vector<1x1xf32>
    %50 = arith.addf %43, %49 : vector<1x1xf32>
    %c0_19 = arith.constant 0 : index
    %c0_20 = arith.constant 0 : index
    %51 = vector.load %arg6[%c0_19, %c0_20] : memref<1x1xf32, #tpu.memory_space<vmem>>, vector<1x1xf32>
    tpu.vector_store %arg6[%c0_19, %c0_20], %50 {strides = array<i32>} : memref<1x1xf32, #tpu.memory_space<vmem>>, vector<1x1xf32>,
    %c0_i32_21 = arith.constant 0 : i32
    %52 = arith.cmpi eq, %arg1, %c0_i32_21 : i32
    %53 = arith.extui %52 : i1 to i32
    %c0_i32_22 = arith.constant 0 : i32
    %54 = arith.cmpi ne, %53, %c0_i32_22 : i32
    scf.if %54 {
      %c0_23 = arith.constant 0 : index
      %c0_24 = arith.constant 0 : index
      %55 = vector.load %arg6[%c0_23, %c0_24] : memref<1x1xf32, #tpu.memory_space<vmem>>, vector<1x1xf32>
      %c0_25 = arith.constant 0 : index
      %c0_26 = arith.constant 0 : index
      %56 = vector.load %arg4[%c0_25, %c0_26] : memref<1x1xf32, #tpu.memory_space<vmem>>, vector<1x1xf32>
      tpu.vector_store %arg4[%c0_25, %c0_26], %55 {strides = array<i32>} : memref<1x1xf32, #tpu.memory_space<vmem>>, vector<1x1xf32>,
    } else {
    }
    return
  }
  func.func @transform_0(%arg0: i32, %arg1: i32) -> (i32, i32) {
    %c1_i32 = arith.constant 1 : i32
    %0 = arith.muli %arg0, %c1_i32 : i32
    %1 = arith.addi %0, %arg1 : i32
    %c0_i32 = arith.constant 0 : i32
    %2 = arith.minsi %1, %c0_i32 : i32
    %c0_i32_0 = arith.constant 0 : i32
    %c0_i32_1 = arith.constant 0 : i32
    return %2, %c0_i32_0 : i32, i32
  }
  func.func @transform_1(%arg0: i32, %arg1: i32) -> (i32, i32) {
    %c1_i32 = arith.constant 1 : i32
    %0 = arith.muli %arg0, %c1_i32 : i32
    %1 = arith.addi %0, %arg1 : i32
    %c0_i32 = arith.constant 0 : i32
    %2 = arith.minsi %1, %c0_i32 : i32
    %c0_i32_0 = arith.constant 0 : i32
    %c0_i32_1 = arith.constant 0 : i32
    return %2, %c0_i32_0 : i32, i32
  }
  func.func @transform_2(%arg0: i32, %arg1: i32) -> (i32, i32) {
    %c0_i32 = arith.constant 0 : i32
    %c0_i32_0 = arith.constant 0 : i32
    return %arg0, %c0_i32 : i32, i32
  }
}

</mosaic_0001>

<bundles_post_ra>
// kernel: tpu_custom_call.1
= control target key start
LH: loop header
LB: loop body
LE: loop exit
PB: predicated region body
PF: predicated region fallthrough
CT: control target
= control target key end

     0   :  { %vm84_vm0 = vcmask 80896   ;;  %v524_v5 = vmov 0   ;;  %s724_s0 = inlined_call_operand.vmem [shape: s32[64,1], index: 0, kind: input, shape index: {}]   ;;  %s725_s1 = inlined_call_operand.vmem [shape: f32[64,10], index: 1, kind: input, shape index: {}]   ;;  %s726_s2 = inlined_call_operand.hbm [shape: f32[1,1], index: 2, kind: output, shape index: {}]  }
   0x1   :  { %v545_v0 = vld [vmem:[%s725_s1 + $0x20] sm:$0xff]  ;;  %v559_v4 = vld [vmem:[%s725_s1 + $0x10] sm:$0xff]  ;;  %464 = vset.pattern.permute.xlu0 %v524_v5  ;;  %463 = vset.pattern.permute.xlu2 %v524_v5 }
   0x2   :  { %v550_v1 = vld [vmem:[%s725_s1] sm:$0xff]  ;;  %v166_v2 = vsel %vm84_vm0, %v545_v0, -inf  ;;  %v160_v6 = vsel %vm84_vm0, %v559_v4, -inf }
   0x3   :  { %v154_v3 = vsel %vm84_vm0, %v550_v1, -inf  ;;  %167 = vmax.xlane.f32.xlu2 %v166_v2  ;;  %161 = vmax.xlane.f32.xlu1 %v160_v6 }
   0x4   :  { %155 = vmax.xlane.f32.xlu0 %v154_v3 }
   0x5   :  { %7 = vsyncpa [#allocation5], 0  ;;  %v566_v7 = vld [vmem:[%s725_s1 + $0x28] sm:$0xff]  ;;  %465 = vset.pattern.permute.xlu1 %v524_v5  ;;  %v576_v9 = vld [vmem:[%s725_s1 + $0x18] sm:$0xff]  ;;  %v82_v26 = vlaneseq  ;;  %v250_v28 = vsel %vm84_vm0, %v550_v1, 0.0  ;;  %v256_v30 = vsel %vm84_vm0, %v559_v4, 0.0 }
   0x6   :  { %v571_v8 = vld [vmem:[%s725_s1 + $0x8] sm:$0xff]  ;;  %v169_v10 = vsel %vm84_vm0, %v566_v7, -inf  ;;  %v163_v12 = vsel %vm84_vm0, %v576_v9, -inf  ;;  %v587_v13 = vld [vmem:[%s725_s1 + $0x30] sm:$0xff]  ;;  %v592_v14 = vld [vmem:[%s725_s1 + $0x38] sm:$0xff]  ;;  %v259_v29 = vsel %vm84_vm0, %v576_v9, 0.0 }
   0x7   :  { %v157_v11 = vsel %vm84_vm0, %v571_v8, -inf  ;;  %v172_v15 = vsel %vm84_vm0, %v587_v13, -inf  ;;  %v175_v16 = vsel %vm84_vm0, %v592_v14, -inf  ;;  %v274_v17 = vld [vmem:[%s724_s0] sm:$0xff]  ;;  %v275_v18 = vld [vmem:[%s724_s0 + $0x8] sm:$0xff]  ;;  %v277_v19 = vld [vmem:[%s724_s0 + $0x18] sm:$0xff] }
   0x8   :  { %v276_v20 = vld [vmem:[%s724_s0 + $0x10] sm:$0xff]  ;;  %v278_v21 = vld [vmem:[%s724_s0 + $0x20] sm:$0xff]  ;;  %v279_v22 = vld [vmem:[%s724_s0 + $0x28] sm:$0xff]  ;;  %v253_v25 = vsel %vm84_vm0, %v571_v8, 0.0  ;;  %v83_v27 = vand.u32 127, %v82_v26  ;;  %vm395_vm9 = vcmask 7168  }
   0x9   :  { %v280_v23 = vld [vmem:[%s724_s0 + $0x30] sm:$0xff]  ;;  %v281_v24 = vld [vmem:[%s724_s0 + $0x38] sm:$0xff]  ;;  %vm80_vm10 = vcmask 0   ;;  %s526_s13 = smov [#allocation4]   ;;  %s437_s17 = sshll.u32 %s726_s2, 4  ;;  %s438_s17 = int_to_ptr.hbm [resolvable:$true] %s437_s17 }
   0xa   :  { %85 = vst.msk [vmem:[#allocation2] sm:$0xff] %vm84_vm0, %v83_v27  ;;  %s435_s14 = sshll.u32 %s526_s13, 4  ;;  %s436_s14 = int_to_ptr.vmem [resolvable:$true] %s435_s14 }
   0xb   :  { %170 = vmax.xlane.f32.xlu2 %v169_v10  ;;  %164 = vmax.xlane.f32.xlu1 %v163_v12  ;;  %86 = vst.msk [vmem:[#allocation2 + $0x8] sm:$0xff] %vm84_vm0, %v83_v27 }
   0xc   :  { %158 = vmax.xlane.f32.xlu0 %v157_v11  ;;  %87 = vst.msk [vmem:[#allocation2 + $0x10] sm:$0xff] %vm84_vm0, %v83_v27 }
   0xd   :  { %88 = vst.msk [vmem:[#allocation2 + $0x18] sm:$0xff] %vm84_vm0, %v83_v27 }
   0xe   :  { %89 = vst.msk [vmem:[#allocation2 + $0x20] sm:$0xff] %vm84_vm0, %v83_v27 }
   0xf   :  { %90 = vst.msk [vmem:[#allocation2 + $0x28] sm:$0xff] %vm84_vm0, %v83_v27 }
  0x10   :  { %91 = vst.msk [vmem:[#allocation2 + $0x30] sm:$0xff] %vm84_vm0, %v83_v27 }
  0x11   :  { %92 = vst.msk [vmem:[#allocation2 + $0x38] sm:$0xff] %vm84_vm0, %v83_v27  ;;  %v282_v42 = vld [vmem:[#allocation2] sm:$0xff] }
  0x12   :  { %v283_v2 = vld [vmem:[#allocation2 + $0x8] sm:$0xff] }
  0x13   :  { %176 = vmax.xlane.f32.xlu1 %v175_v16 }
  0x14   :  { %173 = vmax.xlane.f32.xlu0 %v172_v15  ;;  %v285_v63 = vld [vmem:[#allocation2 + $0x18] sm:$0xff] }
  0x17   :  { %v288_v27 = vld [vmem:[#allocation2 + $0x30] sm:$0xff] }
  0x23   :  { %291 = vperm.xlu2 %463, %v274_v17  }
  0x28   :  { %294 = vperm.xlu0 %464, %v275_v18  }
  0x2b   :  { %300 = vperm.xlu2 %463, %v277_v19   ;;  %v286_v19 = vld [vmem:[#allocation2 + $0x20] sm:$0xff] }
  0x2c   :  { %297 = vperm.xlu1 %465, %v276_v20  }
  0x33   :  { %303 = vperm.xlu2 %463, %v278_v21   ;;  %v262_v21 = vsel %vm84_vm0, %v545_v0, 0.0 }
  0x34   :  { %306 = vperm.xlu1 %465, %v279_v22  }
  0x3b   :  { %309 = vperm.xlu2 %463, %v280_v23  }
  0x3c   :  { %312 = vperm.xlu1 %465, %v281_v24  }
  0x52   :  { %254 = vadd.xlane.f32.xlu0 %v253_v25  ;;  %v268_v25 = vsel %vm84_vm0, %v587_v13, 0.0 }
  0x5a   :  { %260 = vadd.xlane.f32.xlu0 %v259_v29 }
  0x64   :  { %251 = vadd.xlane.f32.xlu2 %v250_v28 }
  0x6c   :  { %257 = vadd.xlane.f32.xlu2 %v256_v30 }
  0x76   :  { %v638_v31 = vpop.xlane.xlu2 %167  ;;  %v642_v33 = vpop.xlane.xlu1 %161 }
  0x77   :  { %v640_v32 = vpop.xlane.xlu0 %155  ;;  %v182_v44 = vsub.f32 %v545_v0, %v638_v31  ;;  %v180_v59 = vsub.f32 %v559_v4, %v642_v33 }
  0x78   :  { %v178_v36 = vsub.f32 %v550_v1, %v640_v32 }
  0x79   :  { %v194_v51 = vmul.f32 1.442695, %v182_v44  ;;  %v265_v44 = vsel %vm84_vm0, %v566_v7, 0.0 }
  0x7a   :  { %v186_v41 = vmul.f32 1.442695, %v178_v36 }
  0x7e   :  { %v644_v34 = vpop.xlane.xlu2 %170  ;;  %v652_v38 = vpop.xlane.xlu1 %164 }
  0x7f   :  { %v646_v35 = vpop.xlane.xlu0 %158  ;;  %v181_v39 = vsub.f32 %v576_v9, %v652_v38  ;;  %v183_v5 = vsub.f32 %v566_v7, %v644_v34 }
  0x80   :  { %v179_v37 = vsub.f32 %v571_v8, %v646_v35 }
  0x81   :  { %v192_v43 = vmul.f32 1.442695, %v181_v39  ;;  %v196_v16 = vmul.f32 1.442695, %v183_v5  ;;  %v271_v39 = vsel %vm84_vm0, %v592_v14, 0.0 }
  0x82   :  { %v188_v40 = vmul.f32 1.442695, %v179_v37 }
  0x84   :  { %466 = vpow2.f32 %v188_v40 }
  0x85   :  { %468 = vpow2.f32 %v186_v41 }
  0x86   :  { %v292_v45 = vpop.permute.xlu2 %291  ;;  %v658_v46 = vpop.xlane.xlu1 %176  ;;  %470 = vpow2.f32 %v192_v43 }
  0x87   :  { %vm314_vm1 = vcmp.eq.s32.totalorder %v282_v42, %v292_v45  ;;  %v185_v48 = vsub.f32 %v592_v14, %v658_v46  ;;  %472 = vpow2.f32 %v194_v51  ;;  %v665_v56 = vpop.xlane.xlu0 %173  ;;  %v287_v45 = vld [vmem:[#allocation2 + $0x28] sm:$0xff] }
  0x88   :  { %v322_v47 = vsel %vm314_vm1, %v550_v1, 0.0  ;;  %v190_v1 = vmul.f32 1.442695, %v180_v59 }
  0x89   :  { %v330_v49 = vsel %vm84_vm0, %v322_v47, 0.0  ;;  %v200_v53 = vmul.f32 1.442695, %v185_v48 }
  0x8a   :  { %v467_v50 = vpop.eup %466  ;;  %331 = vadd.xlane.f32.xlu0 %v330_v49  ;;  %v289_v49 = vld [vmem:[#allocation2 + $0x38] sm:$0xff] }
  0x8b   :  { %v205_v52 = vsel %vm84_vm0, %v467_v50, 0.0  ;;  %v469_v54 = vpop.eup %468  ;;  %474 = vpow2.f32 %v200_v53 }
  0x8c   :  { %206 = vadd.xlane.f32.xlu2 %v205_v52  ;;  %v471_v55 = vpop.eup %470  ;;  %v202_v57 = vsel %vm84_vm0, %v469_v54, 0.0  ;;  %476 = vpow2.f32 %v190_v1 }
  0x8d   :  { %v211_v58 = vsel %vm84_vm0, %v471_v55, 0.0  ;;  %v473_v60 = vpop.eup %472  ;;  %478 = vpow2.f32 %v196_v16 }
  0x8e   :  { %v301_v61 = vpop.permute.xlu2 %300  ;;  %v214_v3 = vsel %vm84_vm0, %v473_v60, 0.0 }
  0x8f   :  { %vm317_vm2 = vcmp.eq.s32.totalorder %v285_v63, %v301_v61 }
  0x90   :  { %v325_v15 = vsel %vm317_vm2, %v576_v9, 0.0 }
  0x91   :  { %v475_v62 = vpop.eup %474  ;;  %v339_v18 = vsel %vm84_vm0, %v325_v15, 0.0 }
  0x92   :  { %203 = vadd.xlane.f32.xlu0 %v202_v57  ;;  %v223_v10 = vsel %vm84_vm0, %v475_v62, 0.0  ;;  %v477_v20 = vpop.eup %476 }
  0x93   :  { %v208_v22 = vsel %vm84_vm0, %v477_v20, 0.0  ;;  %v479_v23 = vpop.eup %478 }
  0x94   :  { %212 = vadd.xlane.f32.xlu2 %v211_v58  ;;  %v217_v29 = vsel %vm84_vm0, %v479_v23, 0.0 }
  0x96   :  { %v304_v17 = vpop.permute.xlu2 %303 }
  0x97   :  { %vm318_vm4 = vcmp.eq.s32.totalorder %v286_v19, %v304_v17 }
  0x98   :  { %v326_v9 = vsel %vm318_vm4, %v545_v0, 0.0  ;;  %v284_v0 = vld [vmem:[#allocation2 + $0x10] sm:$0xff] }
  0x99   :  { %v342_v28 = vsel %vm84_vm0, %v326_v9, 0.0 }
  0x9a   :  { %v295_v6 = vpop.permute.xlu0 %294  ;;  %215 = vadd.xlane.f32.xlu0 %v214_v3 }
  0x9b   :  { %vm315_vm3 = vcmp.eq.s32.totalorder %v283_v2, %v295_v6 }
  0x9c   :  { %v323_v11 = vsel %vm315_vm3, %v571_v8, 0.0  ;;  %224 = vadd.xlane.f32.xlu2 %v223_v10  ;;  %v184_v8 = vsub.f32 %v587_v13, %v665_v56 }
  0x9d   :  { %v333_v12 = vsel %vm84_vm0, %v323_v11, 0.0 }
  0x9e   :  { %334 = vadd.xlane.f32.xlu1 %v333_v12  ;;  %v198_v24 = vmul.f32 1.442695, %v184_v8  ;;  %v310_v26 = vpop.permute.xlu2 %309  ;;  %v298_v40 = vpop.permute.xlu1 %297 }
  0x9f   :  { %vm320_vm5 = vcmp.eq.s32.totalorder %v288_v27, %v310_v26  ;;  %vm316_vm6 = vcmp.eq.s32.totalorder %v284_v0, %v298_v40 }
  0xa0   :  { %480 = vpow2.f32 %v198_v24  ;;  %v328_v30 = vsel %vm320_vm5, %v587_v13, 0.0  ;;  %v324_v42 = vsel %vm316_vm6, %v559_v4, 0.0 }
  0xa1   :  { %v348_v37 = vsel %vm84_vm0, %v328_v30, 0.0  ;;  %v336_v43 = vsel %vm84_vm0, %v324_v42, 0.0 }
  0xa2   :  { %340 = vadd.xlane.f32.xlu0 %v339_v18 }
  0xa4   :  { %263 = vadd.xlane.f32.xlu2 %v262_v21 }
  0xa6   :  { %209 = vadd.xlane.f32.xlu1 %v208_v22  ;;  %v481_v36 = vpop.eup %480  ;;  %v307_v13 = vpop.permute.xlu1 %306 }
  0xa7   :  { %v220_v41 = vsel %vm84_vm0, %v481_v36, 0.0  ;;  %vm319_vm7 = vcmp.eq.s32.totalorder %v287_v45, %v307_v13 }
  0xa8   :  { %v327_v47 = vsel %vm319_vm7, %v566_v7, 0.0 }
  0xa9   :  { %v345_v50 = vsel %vm84_vm0, %v327_v47, 0.0 }
  0xaa   :  { %269 = vadd.xlane.f32.xlu0 %v268_v25 }
  0xac   :  { %343 = vadd.xlane.f32.xlu2 %v342_v28 }
  0xae   :  { %218 = vadd.xlane.f32.xlu1 %v217_v29  ;;  %v313_v48 = vpop.permute.xlu1 %312 }
  0xaf   :  { %vm321_vm8 = vcmp.eq.s32.totalorder %v289_v49, %v313_v48 }
  0xb0   :  { %v329_v4 = vsel %vm321_vm8, %v592_v14, 0.0 }
  0xb1   :  { %v351_v51 = vsel %vm84_vm0, %v329_v4, 0.0 }
  0xb2   :  { %349 = vadd.xlane.f32.xlu0 %v348_v37 }
  0xb4   :  { %272 = vadd.xlane.f32.xlu2 %v271_v39 }
  0xb6   :  { %221 = vadd.xlane.f32.xlu1 %v220_v41 }
  0xbe   :  { %337 = vadd.xlane.f32.xlu1 %v336_v43 }
  0xc5   :  { %v255_v52 = vpop.xlane.xlu0 %254 }
  0xc6   :  { %266 = vadd.xlane.f32.xlu1 %v265_v44  ;;  %v355_v19 = vmul.f32 0.011111111, %v255_v52 }
  0xcd   :  { %v261_v54 = vpop.xlane.xlu0 %260 }
  0xce   :  { %346 = vadd.xlane.f32.xlu1 %v345_v50  ;;  %v357_v36 = vmul.f32 0.011111111, %v261_v54 }
  0xd6   :  { %352 = vadd.xlane.f32.xlu1 %v351_v51 }
  0xd7   :  { %v252_v53 = vpop.xlane.xlu2 %251 }
  0xd8   :  { %v354_v11 = vmul.f32 0.011111111, %v252_v53 }
  0xdf   :  { %v258_v55 = vpop.xlane.xlu2 %257 }
  0xe0   :  { %v356_v25 = vmul.f32 0.011111111, %v258_v55 }
  0xfd   :  { %v332_v57 = vpop.xlane.xlu0 %331 }
  0xfe   :  { %v370_v21 = vmul.f32 0.8888889, %v332_v57 }
  0xff   :  { %v207_v58 = vpop.xlane.xlu2 %206 }
 0x105   :  { %v204_v7 = vpop.xlane.xlu0 %203 }
 0x106   :  { %482 = vlog2.f32 %v204_v7 }
 0x107   :  { %v213_v61 = vpop.xlane.xlu2 %212  ;;  %484 = vlog2.f32 %v207_v58 }
 0x10c   :  { %v483_v14 = vpop.eup %482 }
 0x10d   :  { %v216_v63 = vpop.xlane.xlu0 %215  ;;  %v485_v2 = vpop.eup %484  ;;  %v227_v5 = vmul.f32 0.6931472, %v483_v14 }
 0x10e   :  { %v229_v10 = vmul.f32 0.6931472, %v485_v2 }
 0x10f   :  { %v225_v1 = vpop.xlane.xlu2 %224  ;;  %v242_v12 = vadd.f32 %v227_v5, %v640_v32 }
 0x110   :  { %v243_v20 = vadd.f32 %v229_v10, %v646_v35 }
 0x111   :  { %v335_v59 = vpop.xlane.xlu1 %334  ;;  %v362_v22 = vsub.f32 %v242_v12, %v354_v11 }
 0x112   :  { %v371_v9 = vmul.f32 0.8888889, %v335_v59  ;;  %v363_v26 = vsub.f32 %v243_v20, %v355_v19 }
 0x113   :  { %v378_v28 = vsub.f32 %v362_v22, %v370_v21 }
 0x114   :  { %v379_v29 = vsub.f32 %v363_v26, %v371_v9 }
 0x115   :  { %v341_v15 = vpop.xlane.xlu0 %340  ;;  %v396_v43 = vsel %vm395_vm9, %v378_v28, 0.0 }
 0x116   :  { %v397_v13 = vsel %vm395_vm9, %v379_v29, 0.0  ;;  %v373_v44 = vmul.f32 0.8888889, %v341_v15 }
 0x117   :  { %v264_v17 = vpop.xlane.xlu2 %263  ;;  %v398_v4 = vadd.f32 %v397_v13, %v396_v43 }
 0x118   :  { %v358_v47 = vmul.f32 0.011111111, %v264_v17 }
 0x119   :  { %v210_v60 = vpop.xlane.xlu1 %209 }
 0x11a   :  { %486 = vlog2.f32 %v210_v60 }
 0x11b   :  { %488 = vlog2.f32 %v213_v61 }
 0x11c   :  { %490 = vlog2.f32 %v216_v63 }
 0x11d   :  { %v270_v39 = vpop.xlane.xlu0 %269 }
 0x11e   :  { %v360_v57 = vmul.f32 0.011111111, %v270_v39 }
 0x120   :  { %v487_v6 = vpop.eup %486 }
 0x121   :  { %v219_v62 = vpop.xlane.xlu1 %218  ;;  %v231_v16 = vmul.f32 0.6931472, %v487_v6  ;;  %v489_v18 = vpop.eup %488 }
 0x122   :  { %492 = vlog2.f32 %v219_v62  ;;  %v233_v24 = vmul.f32 0.6931472, %v489_v18  ;;  %v491_v27 = vpop.eup %490 }
 0x123   :  { %v244_v23 = vadd.f32 %v231_v16, %v642_v33  ;;  %v235_v37 = vmul.f32 0.6931472, %v491_v27  ;;  %v344_v33 = vpop.xlane.xlu2 %343 }
 0x124   :  { %v245_v0 = vadd.f32 %v233_v24, %v652_v38  ;;  %v374_v52 = vmul.f32 0.8888889, %v344_v33  ;;  %v525_v24 = vmov 0.0  }
 0x125   :  { %v364_v30 = vsub.f32 %v244_v23, %v356_v25  ;;  %v246_v48 = vadd.f32 %v235_v37, %v638_v31  ;;  %81 = vst.msk [vmem:[#allocation3] sm:$0x1] %vm80_vm10, %v525_v24 }
 0x126   :  { %v365_v45 = vsub.f32 %v245_v0, %v357_v36 }
 0x127   :  { %v366_v55 = vsub.f32 %v246_v48, %v358_v47 }
 0x128   :  { %v493_v35 = vpop.eup %492  ;;  %v381_v51 = vsub.f32 %v365_v45, %v373_v44 }
 0x129   :  { %v222_v3 = vpop.xlane.xlu1 %221  ;;  %v237_v49 = vmul.f32 0.6931472, %v493_v35  ;;  %v382_v31 = vsub.f32 %v366_v55, %v374_v52 }
 0x12a   :  { %494 = vlog2.f32 %v222_v3  ;;  %v401_v61 = vsel %vm395_vm9, %v381_v51, 0.0 }
 0x12b   :  { %496 = vlog2.f32 %v225_v1  ;;  %v247_v58 = vadd.f32 %v237_v49, %v644_v34  ;;  %v350_v1 = vpop.xlane.xlu0 %349  ;;  %v273_v14 = vpop.xlane.xlu2 %272  ;;  %v403_v10 = vsel %vm395_vm9, %v382_v31, 0.0 }
 0x12c   :  { %v376_v11 = vmul.f32 0.8888889, %v350_v1  ;;  %v361_v12 = vmul.f32 0.011111111, %v273_v14 }
 0x130   :  { %v495_v41 = vpop.eup %494 }
 0x131   :  { %v338_v8 = vpop.xlane.xlu1 %337  ;;  %v239_v38 = vmul.f32 0.6931472, %v495_v41  ;;  %v497_v60 = vpop.eup %496 }
 0x132   :  { %v372_v32 = vmul.f32 0.8888889, %v338_v8  ;;  %v241_v3 = vmul.f32 0.6931472, %v497_v60 }
 0x133   :  { %v248_v59 = vadd.f32 %v239_v38, %v665_v56 }
 0x134   :  { %v380_v40 = vsub.f32 %v364_v30, %v372_v32  ;;  %v249_v15 = vadd.f32 %v241_v3, %v658_v46  ;;  %v394_v30 = vld [vmem:[#allocation3] sm:$0x1] }
 0x135   :  { %v368_v5 = vsub.f32 %v248_v59, %v360_v57 }
 0x136   :  { %v399_v50 = vsel %vm395_vm9, %v380_v40, 0.0  ;;  %v369_v19 = vsub.f32 %v249_v15, %v361_v12 }
 0x137   :  { %v400_v54 = vadd.f32 %v399_v50, %v398_v4  ;;  %v384_v16 = vsub.f32 %v368_v5, %v376_v11 }
 0x139   :  { %v267_v42 = vpop.xlane.xlu1 %266  ;;  %v402_v2 = vadd.f32 %v401_v61, %v400_v54  ;;  %v407_v8 = vsel %vm395_vm9, %v384_v16, 0.0 }
 0x13a   :  { %v359_v53 = vmul.f32 0.011111111, %v267_v42 }
 0x13b   :  { %v404_v56 = vadd.f32 %v403_v10, %v402_v2 }
 0x13c   :  { %v367_v62 = vsub.f32 %v247_v58, %v359_v53 }
 0x141   :  { %v347_v7 = vpop.xlane.xlu1 %346 }
 0x142   :  { %v375_v63 = vmul.f32 0.8888889, %v347_v7 }
 0x144   :  { %v383_v6 = vsub.f32 %v367_v62, %v375_v63 }
 0x146   :  { %v405_v34 = vsel %vm395_vm9, %v383_v6, 0.0 }
 0x147   :  { %v406_v18 = vadd.f32 %v405_v34, %v404_v56 }
 0x149   :  { %v353_v17 = vpop.xlane.xlu1 %352  ;;  %v408_v22 = vadd.f32 %v407_v8, %v406_v18 }
 0x14a   :  { %v377_v20 = vmul.f32 0.8888889, %v353_v17 }
 0x14c   :  { %v385_v21 = vsub.f32 %v369_v19, %v377_v20 }
 0x14e   :  { %v409_v9 = vsel %vm395_vm9, %v385_v21, 0.0 }
 0x14f   :  { %v410_v23 = vadd.f32 %v409_v9, %v408_v22 }
 0x151   :  { %411 = vadd.xlane.f32.xlu2 %v410_v23 }
 0x1c4   :  { %v412_v25 = vpop.xlane.xlu2 %411 }
 0x1c5   :  { %v413_v26 = vrot.slane %v412_v25, 4 }
 0x1c7   :  { %v414_v46 = vadd.f32 %v413_v26, %v412_v25 }
 0x1c9   :  { %v415_v32 = vrot.slane %v414_v46, 2 }
 0x1cb   :  { %v416_v27 = vadd.f32 %v415_v32, %v414_v46 }
 0x1cd   :  { %v417_v28 = vrot.slane %v416_v27, 1 }
 0x1cf   :  { %v418_v29 = vadd.f32 %v417_v28, %v416_v27 }
 0x1d1   :  { %458 = vpush %v418_v29 }
 0x202   :  { %s459_s0 = spop %458 }
 0x203   :  { %s420_s12 = smul.f32 0.015625, %s459_s0 }
 0x205   :  { %v421_v36 = vstv %s420_s12 }
 0x206   :  { %v422_v0 = vadd.f32 %v421_v36, %v394_v30 }
 0x208   :  { %424 = vst.msk [vmem:[#allocation3] sm:$0x1] %vm80_vm10, %v422_v0 }
 0x20f   :  { %v428_v35 = vld [vmem:[#allocation3] sm:$0x1] }
 0x210   :  { %429 = vst.msk [vmem:[#allocation4] sm:$0x1] %vm80_vm10, %v428_v35 }
 0x211   :  { %440 = dma.vmem_to_hbm [thread:$0]  %s436_s14, 16, %s438_s17, [#allocation5]  }
 0x212   :  { %522 = dma.done.wait [#allocation5], 16  }
 0x213   :  { %523 = vsyncadd [#allocation5], 4294967280 }
 0x214   :  { %445 = vsyncpa [#allocation5], 1 }

</bundles_post_ra>
